<compile_context>
chip_gen: v7x
topology: tpu7x:2x2x1
jax: 0.10.0
libtpu: 0.0.40
codegen_flags: <defaults>
</compile_context>

<pallas_src>
import functools

import jax
import jax.numpy as jnp
from jax import lax
from jax.experimental import pallas as pl
from jax.experimental.pallas import tpu as pltpu


# ----------------------------------------------------------------------------
# Kernel 1: batched input-side gate pre-computation.
#   gates_x[r] = (emb[r] * mask_emb[r % B]) @ W_ih + (b_ih + b_hh)
#   grid = (num_row_tiles,), all tiles independent -> "parallel".
# ----------------------------------------------------------------------------
def gates_x_kernel(x_ref, mask_ref, wih_ref, b_ref, out_ref):
    x = (x_ref[...] * mask_ref[...]).astype(jnp.bfloat16)      # fused dropout
    out_ref[...] = (
        jnp.dot(x, wih_ref[...], preferred_element_type=jnp.float32)
        + b_ref[...]
    )


def gates_x_forward(emb_flat, mask_tile, w_ih_bf, bias, r_tile):
    """emb_flat: (T*B, E) f32 (t-major rows); returns (T*B, 4H) f32."""
    R, E = emb_flat.shape
    G = w_ih_bf.shape[1]
    return pl.pallas_call(
        gates_x_kernel,
        out_shape=jax.ShapeDtypeStruct((R, G), jnp.float32),
        grid_spec=pltpu.PrefetchScalarGridSpec(
            num_scalar_prefetch=0,
            grid=(R // r_tile,),
            in_specs=[
                pl.BlockSpec((r_tile, E), lambda r: (r, 0)),   # emb rows
                pl.BlockSpec((r_tile, E), lambda r: (0, 0)),   # tiled emb mask
                pl.BlockSpec((E, G), lambda r: (0, 0)),        # W_ih^T (bf16)
                pl.BlockSpec((1, G), lambda r: (0, 0)),        # b_ih + b_hh
            ],
            out_specs=pl.BlockSpec((r_tile, G), lambda r: (r, 0)),
        ),
        compiler_params=pltpu.CompilerParams(
            dimension_semantics=("parallel",),
        ),
    )(emb_flat, mask_tile, w_ih_bf, bias)


# ----------------------------------------------------------------------------
# Kernel 2: LSTM recurrence over time chunks.
#   grid = (T // t_chunk,) sequential -> "arbitrary"; h/c live in VMEM scratch
#   and persist across grid steps.  Constant-index operands (W_hh, mask_out)
#   are only DMA'd when their block index changes (i.e. once).
# ----------------------------------------------------------------------------
def lstm_kernel(gx_ref, whh_ref, mout_ref, out_ref, h_scr, c_scr):
    @pl.when(pl.program_id(0) == 0)
    def _():
        h_scr[...] = jnp.zeros_like(h_scr)
        c_scr[...] = jnp.zeros_like(c_scr)

    hidden = h_scr.shape[-1]
    whh = whh_ref[...]          # (H, 4H) bf16, resident across the chunk
    mout = mout_ref[...]        # (B, H) f32

    def step(i, carry):
        h, c = carry
        # Only the recurrent matmul + elementwise math is on the serial path.
        gates = gx_ref[i] + jnp.dot(
            h.astype(jnp.bfloat16), whh, preferred_element_type=jnp.float32
        )  # (B, 4H), PyTorch gate order i, f, g, o
        i_g = jax.nn.sigmoid(gates[:, 0 * hidden:1 * hidden])
        f_g = jax.nn.sigmoid(gates[:, 1 * hidden:2 * hidden])
        g_g = jnp.tanh(gates[:, 2 * hidden:3 * hidden])
        o_g = jax.nn.sigmoid(gates[:, 3 * hidden:4 * hidden])
        c = f_g * c + i_g * g_g
        h = o_g * jnp.tanh(c)
        out_ref[i] = h * mout   # variational dropout fused into the store
        return (h, c)

    h, c = lax.fori_loop(
        0, out_ref.shape[0], step, (h_scr[...], c_scr[...]), unroll=True
    )
    h_scr[...] = h
    c_scr[...] = c


def lstm_forward(gates_x_tbg, w_hh_bf, mask_out, t_chunk):
    """gates_x_tbg: (T, B, 4H) f32; returns masked lstm_out (T, B, H) f32."""
    T, B, G = gates_x_tbg.shape
    H = w_hh_bf.shape[0]
    return pl.pallas_call(
        lstm_kernel,
        out_shape=jax.ShapeDtypeStruct((T, B, H), jnp.float32),
        grid_spec=pltpu.PrefetchScalarGridSpec(
            num_scalar_prefetch=0,
            grid=(T // t_chunk,),
            in_specs=[
                pl.BlockSpec((t_chunk, B, G), lambda t: (t, 0, 0)),  # gates_x
                pl.BlockSpec((H, G), lambda t: (0, 0)),              # W_hh^T bf16
                pl.BlockSpec((B, H), lambda t: (0, 0)),              # out mask
            ],
            out_specs=pl.BlockSpec((t_chunk, B, H), lambda t: (t, 0, 0)),
            scratch_shapes=[
                pltpu.VMEM((B, H), jnp.float32),  # h
                pltpu.VMEM((B, H), jnp.float32),  # c
            ],
        ),
        compiler_params=pltpu.CompilerParams(
            dimension_semantics=("arbitrary",),
        ),
    )(gates_x_tbg, w_hh_bf, mask_out)


# ----------------------------------------------------------------------------
# Kernel 3: tied-weight projection, flattened + tiled over (vocab, rows).
#   logits[r, v] = lstm_out_flat[r, :] . emb_table[v, :]
#   2-D grid, both axes "parallel" (megacore-shardable); no emb_table.T.
# ----------------------------------------------------------------------------
def proj_kernel(h_ref, w_ref, out_ref):
    h = h_ref[...].astype(jnp.bfloat16)          # (r_tile, H)
    out_ref[...] = lax.dot_general(
        h, w_ref[...],                           # (v_tile, H) bf16, untransposed
        dimension_numbers=(((1,), (1,)), ((), ())),
        preferred_element_type=jnp.float32,
    )


def project_forward(h_flat, emb_bf, r_tile, v_tile):
    """h_flat: (T*B, H) f32; emb_bf: (V, E==H) bf16; returns (T*B, V) f32."""
    R, H = h_flat.shape
    V = emb_bf.shape[0]
    return pl.pallas_call(
        proj_kernel,
        out_shape=jax.ShapeDtypeStruct((R, V), jnp.float32),
        grid_spec=pltpu.PrefetchScalarGridSpec(
            num_scalar_prefetch=0,
            grid=(V // v_tile, R // r_tile),      # weight tile reused across rows
            in_specs=[
                pl.BlockSpec((r_tile, H), lambda v, r: (r, 0)),
                pl.BlockSpec((v_tile, H), lambda v, r: (v, 0)),
            ],
            out_specs=pl.BlockSpec((r_tile, v_tile), lambda v, r: (r, v)),
        ),
        compiler_params=pltpu.CompilerParams(
            dimension_semantics=("parallel", "parallel"),
            vmem_limit_bytes=64 * 1024 * 1024,
        ),
    )(h_flat, emb_bf)


# ----------------------------------------------------------------------------
# Full forward pass.
# ----------------------------------------------------------------------------
def _divisor_leq(n, cap):
    d = max(1, min(n, cap))
    while n % d:
        d -= 1
    return d


@functools.partial(jax.jit, static_argnames=("training", "is_dropout"))
def lm_lstm_regularized_forward(ids, params, masks, training=True, is_dropout=True):
    emb_table = params["emb_table"]          # (V, E), row pad_index is zero
    w_ih = params["w_ih"]                    # (E, 4H)
    w_hh = params["w_hh"]                    # (H, 4H)
    bias = params["bias"]                    # (1, 4H) == b_ih + b_hh
    mask_emb, mask_out = masks               # (B, E), (B, H)

    if not (is_dropout and training):
        mask_emb = jnp.ones_like(mask_emb)
        mask_out = jnp.ones_like(mask_out)

    B, T = ids.shape
    V, E = emb_table.shape
    H = w_hh.shape[0]
    G = 4 * H
    assert E == H, "weight tying requires emb_size == hidden_size"

    # bf16 copies of the MXU-side weights (halves HBM->VMEM DMA + VMEM
    # residency; v6e/v7x MXU is bf16-native).  In production these would be
    # stored bf16 once rather than cast per call.
    w_ih_bf = w_ih.astype(jnp.bfloat16)
    w_hh_bf = w_hh.astype(jnp.bfloat16)
    emb_bf = emb_table.astype(jnp.bfloat16)  # tied projection weight, kept (V, E)

    # Embedding gather directly in time-major layout (no (B,T,E) transpose).
    emb_tbm = jnp.take(emb_table, ids.T, axis=0)     # (T, B, E)
    emb_flat = emb_tbm.reshape(T * B, E)             # row r = t*B + b

    # Tile choices (demo-sized; at production scale use row tiles 128-256 and
    # vocab tiles 512-2048, smaller on v7x's 64 MiB VMEM).
    r_tile = B * _divisor_leq(T, max(1, 256 // B))   # multiple of B, divides T*B
    t_chunk = _divisor_leq(T, 4)                     # timesteps per LSTM grid step
    v_tile = _divisor_leq(V, 128)

    # 1) Hoisted input-side matmul + embedding dropout + bias.
    mask_emb_tile = jnp.tile(mask_emb, (r_tile // B, 1))   # row r -> mask_emb[r % B]
    gates_x = gates_x_forward(emb_flat, mask_emb_tile, w_ih_bf, bias, r_tile)
    gates_x = gates_x.reshape(T, B, G)

    # 2) Serial recurrence (only h @ W_hh + elementwise on the critical path).
    lstm_out = lstm_forward(gates_x, w_hh_bf, mask_out, t_chunk)     # (T, B, H)

    # 3) Tied projection as one flattened, vocab-tiled matmul.
    logits_flat = project_forward(lstm_out.reshape(T * B, H), emb_bf,
                                  r_tile, v_tile)                    # (T*B, V)

    # (T*B, V) -> (T, B, V) -> (B, V, T), matching torch output.permute(0,2,1).
    # TODO(synk): downstream loss should consume (B, T, V) directly; this final
    # permute exists only to match the module's return layout.
    return jnp.transpose(logits_flat.reshape(T, B, V), (1, 2, 0))


# ----------------------------------------------------------------------------
# Pure-JAX reference (lax.scan), mirroring the same bf16 MXU casts.
# ----------------------------------------------------------------------------
def reference_forward(ids, params, masks):
    emb_table, w_ih, w_hh, bias = (
        params["emb_table"], params["w_ih"], params["w_hh"], params["bias"])
    mask_emb, mask_out = masks
    B, T = ids.shape
    H = w_hh.shape[0]

    w_ih_bf = w_ih.astype(jnp.bfloat16)
    w_hh_bf = w_hh.astype(jnp.bfloat16)
    emb_bf = emb_table.astype(jnp.bfloat16)

    x = jnp.take(emb_table, ids.T, axis=0) * mask_emb[None, :, :]    # (T, B, E)

    def step(carry, x_t):
        h, c = carry
        gx = jnp.dot(x_t.astype(jnp.bfloat16), w_ih_bf,
                     preferred_element_type=jnp.float32) + bias
        gates = gx + jnp.dot(h.astype(jnp.bfloat16), w_hh_bf,
                             preferred_element_type=jnp.float32)
        i_g = jax.nn.sigmoid(gates[:, 0 * H:1 * H])
        f_g = jax.nn.sigmoid(gates[:, 1 * H:2 * H])
        g_g = jnp.tanh(gates[:, 2 * H:3 * H])
        o_g = jax.nn.sigmoid(gates[:, 3 * H:4 * H])
        c = f_g * c + i_g * g_g
        h = o_g * jnp.tanh(c)
        return (h, c), h

    init = (jnp.zeros((B, H), jnp.float32), jnp.zeros((B, H), jnp.float32))
    _, hs = lax.scan(step, init, x)                  # (T, B, H)
    hm = (hs * mask_out[None, :, :]).reshape(T * B, H)
    logits = lax.dot_general(hm.astype(jnp.bfloat16), emb_bf,
                             (((1,), (1,)), ((), ())),
                             preferred_element_type=jnp.float32)
    return jnp.transpose(logits.reshape(T, B, -1), (1, 2, 0))        # (B, V, T)


if __name__ == "__main__":
    # Small shapes consistent with the module's forward.
    B, T = 2, 8
    EMB = HID = 32          # weight tying requires emb_size == hidden_size
    VOCAB = 256
    PAD = 0
    DROPOUT = 0.1

    key = jax.random.PRNGKey(0)
    k_emb, k_ih, k_hh, k_bih, k_bhh, k_ids, k_m1, k_m2 = jax.random.split(key, 8)

    emb_table = jax.random.normal(k_emb, (VOCAB, EMB), jnp.float32) * 0.1
    emb_table = emb_table.at[PAD].set(0.0)           # padding_idx=0 -> zero row
    bound = 1.0 / jnp.sqrt(HID)
    w_ih = jax.random.uniform(k_ih, (EMB, 4 * HID), jnp.float32, -bound, bound)
    w_hh = jax.random.uniform(k_hh, (HID, 4 * HID), jnp.float32, -bound, bound)
    b_ih = jax.random.uniform(k_bih, (4 * HID,), jnp.float32, -bound, bound)
    b_hh = jax.random.uniform(k_bhh, (4 * HID,), jnp.float32, -bound, bound)
    params = {
        "emb_table": emb_table,
        "w_ih": w_ih,
        "w_hh": w_hh,
        "bias": (b_ih + b_hh).reshape(1, 4 * HID),
    }

    # Variational dropout masks: Bernoulli(1-p) per (batch, feature), shared
    # across time, scaled by 1/(1-p)  (same as the torch VariationalDropout).
    keep = 1.0 - DROPOUT
    mask_emb = jax.random.bernoulli(k_m1, keep, (B, EMB)).astype(jnp.float32) / keep
    mask_out = jax.random.bernoulli(k_m2, keep, (B, HID)).astype(jnp.float32) / keep
    masks = (mask_emb, mask_out)

    ids = jax.random.randint(k_ids, (B, T), 0, VOCAB, dtype=jnp.int32)

    out = lm_lstm_regularized_forward(ids, params, masks, training=True)
    out = jax.block_until_ready(out)
    assert out.shape == (B, VOCAB, T), out.shape

    ref = reference_forward(ids, params, masks)
    assert jnp.allclose(out, ref, rtol=1e-2, atol=1e-2), "mismatch vs reference"

    print("KERNEL_OK")
</pallas_src>

<mosaic_0001>
module attributes {stable_mosaic.version = 11 : i64} {
  func.func @gates_x_kernel(%arg0: i32, %arg1: memref<16x32xf32, #tpu.memory_space<vmem>>, %arg2: memref<16x32xf32, #tpu.memory_space<vmem>>, %arg3: memref<32x128xbf16, #tpu.memory_space<vmem>>, %arg4: memref<1x128xf32, #tpu.memory_space<vmem>>, %arg5: memref<16x128xf32, #tpu.memory_space<vmem>>) attributes {dimension_semantics = [#tpu.dimension_semantics<parallel>], iteration_bounds = array<i64: 1>, scalar_prefetch = 0 : i64, scratch_operands = 0 : i64, tpu.core_type = #tpu.core_type<tc>, window_params = [{transform_indices = @transform_0, window_bounds = array<i64: 16, 32>}, {pipeline_mode = #tpu.pipeline_mode<synchronous>, transform_indices = @transform_1, window_bounds = array<i64: 16, 32>}, {pipeline_mode = #tpu.pipeline_mode<synchronous>, transform_indices = @transform_2, window_bounds = array<i64: 32, 128>}, {pipeline_mode = #tpu.pipeline_mode<synchronous>, transform_indices = @transform_3, window_bounds = array<i64: 1, 128>}, {transform_indices = @transform_4, window_bounds = array<i64: 16, 128>}]} {
    %c0 = arith.constant 0 : index
    %c0_0 = arith.constant 0 : index
    %0 = vector.load %arg1[%c0, %c0_0] : memref<16x32xf32, #tpu.memory_space<vmem>>, vector<16x32xf32>
    %c0_1 = arith.constant 0 : index
    %c0_2 = arith.constant 0 : index
    %1 = vector.load %arg2[%c0_1, %c0_2] : memref<16x32xf32, #tpu.memory_space<vmem>>, vector<16x32xf32>
    %2 = arith.mulf %0, %1 : vector<16x32xf32>
    %3 = arith.truncf %2 : vector<16x32xf32> to vector<16x32xbf16>
    %c0_3 = arith.constant 0 : index
    %c0_4 = arith.constant 0 : index
    %4 = vector.load %arg3[%c0_3, %c0_4] : memref<32x128xbf16, #tpu.memory_space<vmem>>, vector<32x128xbf16>
    %cst = arith.constant dense<0.000000e+00> : vector<16x128xf32>
    %5 = tpu.matmul %3, %4, %cst {dimension_numbers = #tpu.dot_dimension_numbers<[1], [0], [0], [1], [0, 0, 1, 1], [], []>} : vector<16x32xbf16>, vector<32x128xbf16>, vector<16x128xf32> -> vector<16x128xf32>
    %c0_5 = arith.constant 0 : index
    %c0_6 = arith.constant 0 : index
    %6 = vector.load %arg4[%c0_5, %c0_6] : memref<1x128xf32, #tpu.memory_space<vmem>>, vector<1x128xf32>
    %7 = vector.broadcast %6 : vector<1x128xf32> to vector<16x128xf32>
    %8 = arith.addf %5, %7 : vector<16x128xf32>
    %c0_7 = arith.constant 0 : index
    %c0_8 = arith.constant 0 : index
    %9 = vector.load %arg5[%c0_7, %c0_8] : memref<16x128xf32, #tpu.memory_space<vmem>>, vector<16x128xf32>
    tpu.vector_store %arg5[%c0_7, %c0_8], %8 {strides = array<i32>} : memref<16x128xf32, #tpu.memory_space<vmem>>, vector<16x128xf32>,
    return
  }
  func.func @transform_0(%arg0: i32) -> (i32, i32) {
    %c0_i32 = arith.constant 0 : i32
    %c0_i32_0 = arith.constant 0 : i32
    return %arg0, %c0_i32 : i32, i32
  }
  func.func @transform_1(%arg0: i32) -> (i32, i32) {
    %c0_i32 = arith.constant 0 : i32
    %c0_i32_0 = arith.constant 0 : i32
    %c0_i32_1 = arith.constant 0 : i32
    return %c0_i32, %c0_i32_0 : i32, i32
  }
  func.func @transform_2(%arg0: i32) -> (i32, i32) {
    %c0_i32 = arith.constant 0 : i32
    %c0_i32_0 = arith.constant 0 : i32
    %c0_i32_1 = arith.constant 0 : i32
    return %c0_i32, %c0_i32_0 : i32, i32
  }
  func.func @transform_3(%arg0: i32) -> (i32, i32) {
    %c0_i32 = arith.constant 0 : i32
    %c0_i32_0 = arith.constant 0 : i32
    %c0_i32_1 = arith.constant 0 : i32
    return %c0_i32, %c0_i32_0 : i32, i32
  }
  func.func @transform_4(%arg0: i32) -> (i32, i32) {
    %c0_i32 = arith.constant 0 : i32
    %c0_i32_0 = arith.constant 0 : i32
    return %arg0, %c0_i32 : i32, i32
  }
}

module attributes {stable_mosaic.version = 11 : i64} {
  func.func @proj_kernel(%arg0: i32, %arg1: i32, %arg2: memref<16x32xf32, #tpu.memory_space<vmem>>, %arg3: memref<128x32xbf16, #tpu.memory_space<vmem>>, %arg4: memref<16x128xf32, #tpu.memory_space<vmem>>) attributes {dimension_semantics = [#tpu.dimension_semantics<parallel>, #tpu.dimension_semantics<parallel>], iteration_bounds = array<i64: 2, 1>, scalar_prefetch = 0 : i64, scratch_operands = 0 : i64, tpu.core_type = #tpu.core_type<tc>, window_params = [{transform_indices = @transform_0, window_bounds = array<i64: 16, 32>}, {transform_indices = @transform_1, window_bounds = array<i64: 128, 32>}, {transform_indices = @transform_2, window_bounds = array<i64: 16, 128>}]} {
    %c0 = arith.constant 0 : index
    %c0_0 = arith.constant 0 : index
    %0 = vector.load %arg2[%c0, %c0_0] : memref<16x32xf32, #tpu.memory_space<vmem>>, vector<16x32xf32>
    %1 = arith.truncf %0 : vector<16x32xf32> to vector<16x32xbf16>
    %c0_1 = arith.constant 0 : index
    %c0_2 = arith.constant 0 : index
    %2 = vector.load %arg3[%c0_1, %c0_2] : memref<128x32xbf16, #tpu.memory_space<vmem>>, vector<128x32xbf16>
    %cst = arith.constant dense<0.000000e+00> : vector<16x128xf32>
    %3 = tpu.matmul %1, %2, %cst {dimension_numbers = #tpu.dot_dimension_numbers<[1], [1], [0], [0], [0, 0, 1, 0], [], []>} : vector<16x32xbf16>, vector<128x32xbf16>, vector<16x128xf32> -> vector<16x128xf32>
    %c0_3 = arith.constant 0 : index
    %c0_4 = arith.constant 0 : index
    %4 = vector.load %arg4[%c0_3, %c0_4] : memref<16x128xf32, #tpu.memory_space<vmem>>, vector<16x128xf32>
    tpu.vector_store %arg4[%c0_3, %c0_4], %3 {strides = array<i32>} : memref<16x128xf32, #tpu.memory_space<vmem>>, vector<16x128xf32>,
    return
  }
  func.func @transform_0(%arg0: i32, %arg1: i32) -> (i32, i32) {
    %c0_i32 = arith.constant 0 : i32
    %c0_i32_0 = arith.constant 0 : i32
    return %arg1, %c0_i32 : i32, i32
  }
  func.func @transform_1(%arg0: i32, %arg1: i32) -> (i32, i32) {
    %c0_i32 = arith.constant 0 : i32
    %c0_i32_0 = arith.constant 0 : i32
    return %arg0, %c0_i32 : i32, i32
  }
  func.func @transform_2(%arg0: i32, %arg1: i32) -> (i32, i32) {
    %c0_i32 = arith.constant 0 : i32
    return %arg1, %arg0 : i32, i32
  }
}

module attributes {stable_mosaic.version = 11 : i64} {
  func.func @lstm_kernel(%arg0: i32, %arg1: memref<4x2x128xf32, #tpu.memory_space<vmem>>, %arg2: memref<32x128xbf16, #tpu.memory_space<vmem>>, %arg3: memref<2x32xf32, #tpu.memory_space<vmem>>, %arg4: memref<4x2x32xf32, #tpu.memory_space<vmem>>, %arg5: memref<2x32xf32, #tpu.memory_space<vmem>>, %arg6: memref<2x32xf32, #tpu.memory_space<vmem>>) attributes {dimension_semantics = [#tpu.dimension_semantics<arbitrary>], iteration_bounds = array<i64: 2>, scalar_prefetch = 0 : i64, scratch_operands = 2 : i64, tpu.core_type = #tpu.core_type<tc>, window_params = [{transform_indices = @transform_0, window_bounds = array<i64: 4, 2, 128>}, {pipeline_mode = #tpu.pipeline_mode<synchronous>, transform_indices = @transform_1, window_bounds = array<i64: 32, 128>}, {pipeline_mode = #tpu.pipeline_mode<synchronous>, transform_indices = @transform_2, window_bounds = array<i64: 2, 32>}, {transform_indices = @transform_3, window_bounds = array<i64: 4, 2, 32>}]} {
    %c0_i32 = arith.constant 0 : i32
    %0 = arith.cmpi eq, %arg0, %c0_i32 : i32
    %1 = arith.extui %0 : i1 to i32
    %c0_i32_0 = arith.constant 0 : i32
    %2 = arith.cmpi ne, %1, %c0_i32_0 : i32
    scf.if %2 {
      %cst_44 = arith.constant 0.000000e+00 : f32
      %153 = vector.broadcast %cst_44 : f32 to vector<2x32xf32>
      %c0_45 = arith.constant 0 : index
      %c0_46 = arith.constant 0 : index
      %154 = vector.load %arg5[%c0_45, %c0_46] : memref<2x32xf32, #tpu.memory_space<vmem>>, vector<2x32xf32>
      tpu.vector_store %arg5[%c0_45, %c0_46], %153 {strides = array<i32>} : memref<2x32xf32, #tpu.memory_space<vmem>>, vector<2x32xf32>,
      %cst_47 = arith.constant 0.000000e+00 : f32
      %155 = vector.broadcast %cst_47 : f32 to vector<2x32xf32>
      %c0_48 = arith.constant 0 : index
      %c0_49 = arith.constant 0 : index
      %156 = vector.load %arg6[%c0_48, %c0_49] : memref<2x32xf32, #tpu.memory_space<vmem>>, vector<2x32xf32>
      tpu.vector_store %arg6[%c0_48, %c0_49], %155 {strides = array<i32>} : memref<2x32xf32, #tpu.memory_space<vmem>>, vector<2x32xf32>,
    } else {
    }
    %c0 = arith.constant 0 : index
    %c0_1 = arith.constant 0 : index
    %3 = vector.load %arg2[%c0, %c0_1] : memref<32x128xbf16, #tpu.memory_space<vmem>>, vector<32x128xbf16>
    %c0_2 = arith.constant 0 : index
    %c0_3 = arith.constant 0 : index
    %4 = vector.load %arg3[%c0_2, %c0_3] : memref<2x32xf32, #tpu.memory_space<vmem>>, vector<2x32xf32>
    %c0_4 = arith.constant 0 : index
    %c0_5 = arith.constant 0 : index
    %5 = vector.load %arg5[%c0_4, %c0_5] : memref<2x32xf32, #tpu.memory_space<vmem>>, vector<2x32xf32>
    %c0_6 = arith.constant 0 : index
    %c0_7 = arith.constant 0 : index
    %6 = vector.load %arg6[%c0_6, %c0_7] : memref<2x32xf32, #tpu.memory_space<vmem>>, vector<2x32xf32>
    %c0_i32_8 = arith.constant 0 : i32
    %7 = arith.index_cast %c0_i32_8 : i32 to index
    %c0_9 = arith.constant 0 : index
    %c0_10 = arith.constant 0 : index
    %8 = vector.load %arg1[%7, %c0_9, %c0_10] : memref<4x2x128xf32, #tpu.memory_space<vmem>>, vector<1x2x128xf32>
    %9 = vector.shape_cast %8 : vector<1x2x128xf32> to vector<2x128xf32>
    %10 = arith.truncf %5 : vector<2x32xf32> to vector<2x32xbf16>
    %cst = arith.constant dense<0.000000e+00> : vector<2x128xf32>
    %11 = tpu.matmul %10, %3, %cst {dimension_numbers = #tpu.dot_dimension_numbers<[1], [0], [0], [1], [0, 0, 1, 1], [], []>} : vector<2x32xbf16>, vector<32x128xbf16>, vector<2x128xf32> -> vector<2x128xf32>
    %12 = arith.addf %9, %11 : vector<2x128xf32>
    %13 = vector.extract_strided_slice %12 {offsets = [0, 0], sizes = [2, 32], strides = [1, 1]} : vector<2x128xf32> to vector<2x32xf32>
    %14 = arith.negf %13 : vector<2x32xf32>
    %15 = math.exp %14 : vector<2x32xf32>
    %cst_11 = arith.constant 1.000000e+00 : f32
    %16 = vector.broadcast %cst_11 : f32 to vector<2x32xf32>
    %17 = arith.addf %16, %15 : vector<2x32xf32>
    %18 = arith.divf %16, %17 : vector<2x32xf32>
    %19 = vector.extract_strided_slice %12 {offsets = [0, 32], sizes = [2, 32], strides = [1, 1]} : vector<2x128xf32> to vector<2x32xf32>
    %20 = arith.negf %19 : vector<2x32xf32>
    %21 = math.exp %20 : vector<2x32xf32>
    %cst_12 = arith.constant 1.000000e+00 : f32
    %22 = vector.broadcast %cst_12 : f32 to vector<2x32xf32>
    %23 = arith.addf %22, %21 : vector<2x32xf32>
    %24 = arith.divf %22, %23 : vector<2x32xf32>
    %25 = vector.extract_strided_slice %12 {offsets = [0, 64], sizes = [2, 32], strides = [1, 1]} : vector<2x128xf32> to vector<2x32xf32>
    %26 = math.tanh %25 : vector<2x32xf32>
    %27 = vector.extract_strided_slice %12 {offsets = [0, 96], sizes = [2, 32], strides = [1, 1]} : vector<2x128xf32> to vector<2x32xf32>
    %28 = arith.negf %27 : vector<2x32xf32>
    %29 = math.exp %28 : vector<2x32xf32>
    %cst_13 = arith.constant 1.000000e+00 : f32
    %30 = vector.broadcast %cst_13 : f32 to vector<2x32xf32>
    %31 = arith.addf %30, %29 : vector<2x32xf32>
    %32 = arith.divf %30, %31 : vector<2x32xf32>
    %33 = arith.mulf %24, %6 : vector<2x32xf32>
    %34 = arith.mulf %18, %26 : vector<2x32xf32>
    %35 = arith.addf %33, %34 : vector<2x32xf32>
    %36 = math.tanh %35 : vector<2x32xf32>
    %37 = arith.mulf %32, %36 : vector<2x32xf32>
    %38 = arith.mulf %37, %4 : vector<2x32xf32>
    %39 = arith.index_cast %c0_i32_8 : i32 to index
    %c0_14 = arith.constant 0 : index
    %c0_15 = arith.constant 0 : index
    %40 = vector.load %arg4[%39, %c0_14, %c0_15] : memref<4x2x32xf32, #tpu.memory_space<vmem>>, vector<1x2x32xf32>
    %41 = vector.shape_cast %40 : vector<1x2x32xf32> to vector<2x32xf32>
    %42 = vector.shape_cast %38 : vector<2x32xf32> to vector<1x2x32xf32>
    tpu.vector_store %arg4[%39, %c0_14, %c0_15], %42 {strides = array<i32>} : memref<4x2x32xf32, #tpu.memory_space<vmem>>, vector<1x2x32xf32>,
    %c1_i32 = arith.constant 1 : i32
    %43 = arith.index_cast %c1_i32 : i32 to index
    %c0_16 = arith.constant 0 : index
    %c0_17 = arith.constant 0 : index
    %44 = vector.load %arg1[%43, %c0_16, %c0_17] : memref<4x2x128xf32, #tpu.memory_space<vmem>>, vector<1x2x128xf32>
    %45 = vector.shape_cast %44 : vector<1x2x128xf32> to vector<2x128xf32>
    %46 = arith.truncf %37 : vector<2x32xf32> to vector<2x32xbf16>
    %cst_18 = arith.constant dense<0.000000e+00> : vector<2x128xf32>
    %47 = tpu.matmul %46, %3, %cst_18 {dimension_numbers = #tpu.dot_dimension_numbers<[1], [0], [0], [1], [0, 0, 1, 1], [], []>} : vector<2x32xbf16>, vector<32x128xbf16>, vector<2x128xf32> -> vector<2x128xf32>
    %48 = arith.addf %45, %47 : vector<2x128xf32>
    %49 = vector.extract_strided_slice %48 {offsets = [0, 0], sizes = [2, 32], strides = [1, 1]} : vector<2x128xf32> to vector<2x32xf32>
    %50 = arith.negf %49 : vector<2x32xf32>
    %51 = math.exp %50 : vector<2x32xf32>
    %cst_19 = arith.constant 1.000000e+00 : f32
    %52 = vector.broadcast %cst_19 : f32 to vector<2x32xf32>
    %53 = arith.addf %52, %51 : vector<2x32xf32>
    %54 = arith.divf %52, %53 : vector<2x32xf32>
    %55 = vector.extract_strided_slice %48 {offsets = [0, 32], sizes = [2, 32], strides = [1, 1]} : vector<2x128xf32> to vector<2x32xf32>
    %56 = arith.negf %55 : vector<2x32xf32>
    %57 = math.exp %56 : vector<2x32xf32>
    %cst_20 = arith.constant 1.000000e+00 : f32
    %58 = vector.broadcast %cst_20 : f32 to vector<2x32xf32>
    %59 = arith.addf %58, %57 : vector<2x32xf32>
    %60 = arith.divf %58, %59 : vector<2x32xf32>
    %61 = vector.extract_strided_slice %48 {offsets = [0, 64], sizes = [2, 32], strides = [1, 1]} : vector<2x128xf32> to vector<2x32xf32>
    %62 = math.tanh %61 : vector<2x32xf32>
    %63 = vector.extract_strided_slice %48 {offsets = [0, 96], sizes = [2, 32], strides = [1, 1]} : vector<2x128xf32> to vector<2x32xf32>
    %64 = arith.negf %63 : vector<2x32xf32>
    %65 = math.exp %64 : vector<2x32xf32>
    %cst_21 = arith.constant 1.000000e+00 : f32
    %66 = vector.broadcast %cst_21 : f32 to vector<2x32xf32>
    %67 = arith.addf %66, %65 : vector<2x32xf32>
    %68 = arith.divf %66, %67 : vector<2x32xf32>
    %69 = arith.mulf %60, %35 : vector<2x32xf32>
    %70 = arith.mulf %54, %62 : vector<2x32xf32>
    %71 = arith.addf %69, %70 : vector<2x32xf32>
    %72 = math.tanh %71 : vector<2x32xf32>
    %73 = arith.mulf %68, %72 : vector<2x32xf32>
    %74 = arith.mulf %73, %4 : vector<2x32xf32>
    %75 = arith.index_cast %c1_i32 : i32 to index
    %c0_22 = arith.constant 0 : index
    %c0_23 = arith.constant 0 : index
    %76 = vector.load %arg4[%75, %c0_22, %c0_23] : memref<4x2x32xf32, #tpu.memory_space<vmem>>, vector<1x2x32xf32>
    %77 = vector.shape_cast %76 : vector<1x2x32xf32> to vector<2x32xf32>
    %78 = vector.shape_cast %74 : vector<2x32xf32> to vector<1x2x32xf32>
    tpu.vector_store %arg4[%75, %c0_22, %c0_23], %78 {strides = array<i32>} : memref<4x2x32xf32, #tpu.memory_space<vmem>>, vector<1x2x32xf32>,
    %c2_i32 = arith.constant 2 : i32
    %79 = arith.index_cast %c2_i32 : i32 to index
    %c0_24 = arith.constant 0 : index
    %c0_25 = arith.constant 0 : index
    %80 = vector.load %arg1[%79, %c0_24, %c0_25] : memref<4x2x128xf32, #tpu.memory_space<vmem>>, vector<1x2x128xf32>
    %81 = vector.shape_cast %80 : vector<1x2x128xf32> to vector<2x128xf32>
    %82 = arith.truncf %73 : vector<2x32xf32> to vector<2x32xbf16>
    %cst_26 = arith.constant dense<0.000000e+00> : vector<2x128xf32>
    %83 = tpu.matmul %82, %3, %cst_26 {dimension_numbers = #tpu.dot_dimension_numbers<[1], [0], [0], [1], [0, 0, 1, 1], [], []>} : vector<2x32xbf16>, vector<32x128xbf16>, vector<2x128xf32> -> vector<2x128xf32>
    %84 = arith.addf %81, %83 : vector<2x128xf32>
    %85 = vector.extract_strided_slice %84 {offsets = [0, 0], sizes = [2, 32], strides = [1, 1]} : vector<2x128xf32> to vector<2x32xf32>
    %86 = arith.negf %85 : vector<2x32xf32>
    %87 = math.exp %86 : vector<2x32xf32>
    %cst_27 = arith.constant 1.000000e+00 : f32
    %88 = vector.broadcast %cst_27 : f32 to vector<2x32xf32>
    %89 = arith.addf %88, %87 : vector<2x32xf32>
    %90 = arith.divf %88, %89 : vector<2x32xf32>
    %91 = vector.extract_strided_slice %84 {offsets = [0, 32], sizes = [2, 32], strides = [1, 1]} : vector<2x128xf32> to vector<2x32xf32>
    %92 = arith.negf %91 : vector<2x32xf32>
    %93 = math.exp %92 : vector<2x32xf32>
    %cst_28 = arith.constant 1.000000e+00 : f32
    %94 = vector.broadcast %cst_28 : f32 to vector<2x32xf32>
    %95 = arith.addf %94, %93 : vector<2x32xf32>
    %96 = arith.divf %94, %95 : vector<2x32xf32>
    %97 = vector.extract_strided_slice %84 {offsets = [0, 64], sizes = [2, 32], strides = [1, 1]} : vector<2x128xf32> to vector<2x32xf32>
    %98 = math.tanh %97 : vector<2x32xf32>
    %99 = vector.extract_strided_slice %84 {offsets = [0, 96], sizes = [2, 32], strides = [1, 1]} : vector<2x128xf32> to vector<2x32xf32>
    %100 = arith.negf %99 : vector<2x32xf32>
    %101 = math.exp %100 : vector<2x32xf32>
    %cst_29 = arith.constant 1.000000e+00 : f32
    %102 = vector.broadcast %cst_29 : f32 to vector<2x32xf32>
    %103 = arith.addf %102, %101 : vector<2x32xf32>
    %104 = arith.divf %102, %103 : vector<2x32xf32>
    %105 = arith.mulf %96, %71 : vector<2x32xf32>
    %106 = arith.mulf %90, %98 : vector<2x32xf32>
    %107 = arith.addf %105, %106 : vector<2x32xf32>
    %108 = math.tanh %107 : vector<2x32xf32>
    %109 = arith.mulf %104, %108 : vector<2x32xf32>
    %110 = arith.mulf %109, %4 : vector<2x32xf32>
    %111 = arith.index_cast %c2_i32 : i32 to index
    %c0_30 = arith.constant 0 : index
    %c0_31 = arith.constant 0 : index
    %112 = vector.load %arg4[%111, %c0_30, %c0_31] : memref<4x2x32xf32, #tpu.memory_space<vmem>>, vector<1x2x32xf32>
    %113 = vector.shape_cast %112 : vector<1x2x32xf32> to vector<2x32xf32>
    %114 = vector.shape_cast %110 : vector<2x32xf32> to vector<1x2x32xf32>
    tpu.vector_store %arg4[%111, %c0_30, %c0_31], %114 {strides = array<i32>} : memref<4x2x32xf32, #tpu.memory_space<vmem>>, vector<1x2x32xf32>,
    %c3_i32 = arith.constant 3 : i32
    %115 = arith.index_cast %c3_i32 : i32 to index
    %c0_32 = arith.constant 0 : index
    %c0_33 = arith.constant 0 : index
    %116 = vector.load %arg1[%115, %c0_32, %c0_33] : memref<4x2x128xf32, #tpu.memory_space<vmem>>, vector<1x2x128xf32>
    %117 = vector.shape_cast %116 : vector<1x2x128xf32> to vector<2x128xf32>
    %118 = arith.truncf %109 : vector<2x32xf32> to vector<2x32xbf16>
    %cst_34 = arith.constant dense<0.000000e+00> : vector<2x128xf32>
    %119 = tpu.matmul %118, %3, %cst_34 {dimension_numbers = #tpu.dot_dimension_numbers<[1], [0], [0], [1], [0, 0, 1, 1], [], []>} : vector<2x32xbf16>, vector<32x128xbf16>, vector<2x128xf32> -> vector<2x128xf32>
    %120 = arith.addf %117, %119 : vector<2x128xf32>
    %121 = vector.extract_strided_slice %120 {offsets = [0, 0], sizes = [2, 32], strides = [1, 1]} : vector<2x128xf32> to vector<2x32xf32>
    %122 = arith.negf %121 : vector<2x32xf32>
    %123 = math.exp %122 : vector<2x32xf32>
    %cst_35 = arith.constant 1.000000e+00 : f32
    %124 = vector.broadcast %cst_35 : f32 to vector<2x32xf32>
    %125 = arith.addf %124, %123 : vector<2x32xf32>
    %126 = arith.divf %124, %125 : vector<2x32xf32>
    %127 = vector.extract_strided_slice %120 {offsets = [0, 32], sizes = [2, 32], strides = [1, 1]} : vector<2x128xf32> to vector<2x32xf32>
    %128 = arith.negf %127 : vector<2x32xf32>
    %129 = math.exp %128 : vector<2x32xf32>
    %cst_36 = arith.constant 1.000000e+00 : f32
    %130 = vector.broadcast %cst_36 : f32 to vector<2x32xf32>
    %131 = arith.addf %130, %129 : vector<2x32xf32>
    %132 = arith.divf %130, %131 : vector<2x32xf32>
    %133 = vector.extract_strided_slice %120 {offsets = [0, 64], sizes = [2, 32], strides = [1, 1]} : vector<2x128xf32> to vector<2x32xf32>
    %134 = math.tanh %133 : vector<2x32xf32>
    %135 = vector.extract_strided_slice %120 {offsets = [0, 96], sizes = [2, 32], strides = [1, 1]} : vector<2x128xf32> to vector<2x32xf32>
    %136 = arith.negf %135 : vector<2x32xf32>
    %137 = math.exp %136 : vector<2x32xf32>
    %cst_37 = arith.constant 1.000000e+00 : f32
    %138 = vector.broadcast %cst_37 : f32 to vector<2x32xf32>
    %139 = arith.addf %138, %137 : vector<2x32xf32>
    %140 = arith.divf %138, %139 : vector<2x32xf32>
    %141 = arith.mulf %132, %107 : vector<2x32xf32>
    %142 = arith.mulf %126, %134 : vector<2x32xf32>
    %143 = arith.addf %141, %142 : vector<2x32xf32>
    %144 = math.tanh %143 : vector<2x32xf32>
    %145 = arith.mulf %140, %144 : vector<2x32xf32>
    %146 = arith.mulf %145, %4 : vector<2x32xf32>
    %147 = arith.index_cast %c3_i32 : i32 to index
    %c0_38 = arith.constant 0 : index
    %c0_39 = arith.constant 0 : index
    %148 = vector.load %arg4[%147, %c0_38, %c0_39] : memref<4x2x32xf32, #tpu.memory_space<vmem>>, vector<1x2x32xf32>
    %149 = vector.shape_cast %148 : vector<1x2x32xf32> to vector<2x32xf32>
    %150 = vector.shape_cast %146 : vector<2x32xf32> to vector<1x2x32xf32>
    tpu.vector_store %arg4[%147, %c0_38, %c0_39], %150 {strides = array<i32>} : memref<4x2x32xf32, #tpu.memory_space<vmem>>, vector<1x2x32xf32>,
    %c4_i32 = arith.constant 4 : i32
    %c0_40 = arith.constant 0 : index
    %c0_41 = arith.constant 0 : index
    %151 = vector.load %arg5[%c0_40, %c0_41] : memref<2x32xf32, #tpu.memory_space<vmem>>, vector<2x32xf32>
    tpu.vector_store %arg5[%c0_40, %c0_41], %145 {strides = array<i32>} : memref<2x32xf32, #tpu.memory_space<vmem>>, vector<2x32xf32>,
    %c0_42 = arith.constant 0 : index
    %c0_43 = arith.constant 0 : index
    %152 = vector.load %arg6[%c0_42, %c0_43] : memref<2x32xf32, #tpu.memory_space<vmem>>, vector<2x32xf32>
    tpu.vector_store %arg6[%c0_42, %c0_43], %143 {strides = array<i32>} : memref<2x32xf32, #tpu.memory_space<vmem>>, vector<2x32xf32>,
    return
  }
  func.func @transform_0(%arg0: i32) -> (i32, i32, i32) {
    %c0_i32 = arith.constant 0 : i32
    %c0_i32_0 = arith.constant 0 : i32
    %c0_i32_1 = arith.constant 0 : i32
    return %arg0, %c0_i32, %c0_i32_0 : i32, i32, i32
  }
  func.func @transform_1(%arg0: i32) -> (i32, i32) {
    %c0_i32 = arith.constant 0 : i32
    %c0_i32_0 = arith.constant 0 : i32
    %c0_i32_1 = arith.constant 0 : i32
    return %c0_i32, %c0_i32_0 : i32, i32
  }
  func.func @transform_2(%arg0: i32) -> (i32, i32) {
    %c0_i32 = arith.constant 0 : i32
    %c0_i32_0 = arith.constant 0 : i32
    %c0_i32_1 = arith.constant 0 : i32
    return %c0_i32, %c0_i32_0 : i32, i32
  }
  func.func @transform_3(%arg0: i32) -> (i32, i32, i32) {
    %c0_i32 = arith.constant 0 : i32
    %c0_i32_0 = arith.constant 0 : i32
    %c0_i32_1 = arith.constant 0 : i32
    return %arg0, %c0_i32, %c0_i32_0 : i32, i32, i32
  }
}

</mosaic_0001>

<bundles_post_ra>
// kernel: lm_lstm_regularized_forward.3
= control target key start
LH: loop header
LB: loop body
LE: loop exit
PB: predicated region body
PF: predicated region fallthrough
CT: control target
= control target key end

     0   :  { %v118_v0 = vmov 0.0   ;;  %vm119_vm0 = vmmov 0   ;;  %vm48_vm1 = vcmask 261120   ;;  %s172_s2 = inlined_call_operand.vmem [shape: bf16[32,128], index: 2, kind: input, shape index: {}]   ;;  %s173_s0 = inlined_call_operand.vmem [shape: f32[16,32], index: 0, kind: input, shape index: {}]   ;;  %s174_s1 = inlined_call_operand.vmem [shape: f32[16,32], index: 1, kind: input, shape index: {}]   ;;  %s175_s3 = inlined_call_operand.vmem [shape: f32[1,128], index: 3, kind: input, shape index: {}]   ;;  %s176_s4 = inlined_call_operand.vmem [shape: f32[16,128], index: 4, kind: output, shape index: {}]  }
   0x1   :  { %106 = vmatprep.subr.bf16.mxu0 %v118_v0  ;;  %v116_v1 = vld [vmem:[%s172_s2] sm:$0xff]   ;;  %110 = vmatprep.mubr.msk.bf16.mxu0 %vm119_vm0, %v118_v0  ;;  %v117_v2 = vld [vmem:[%s172_s2 + $0x8] sm:$0xff]  }
   0x2   :  { %107 = vmatpush3.bf16.msra.mxu0 %v116_v1  ;;  %v18_v3 = vld [vmem:[%s173_s0] sm:$0xff]  ;;  %v19_v4 = vld [vmem:[%s173_s0 + $0x8] sm:$0xff] }
   0x3   :  { %v20_v5 = vld [vmem:[%s174_s1] sm:$0xff]  ;;  %108 = vmatprep.subr.bf16.mxu0 %v118_v0  ;;  %v21_v6 = vld [vmem:[%s174_s1 + $0x8] sm:$0xff] }
   0x4   :  { %v22_v7 = vmul.f32 %v20_v5, %v18_v3  ;;  %v23_v8 = vmul.f32 %v21_v6, %v19_v4  ;;  %v99_v10 = vld [vmem:[%s175_s3] ss:$0 sm:$0xff] }
   0x6   :  { %109 = vmatpush3.bf16.msra.mxu0 %v117_v2  ;;  %v24_v9 = vpack.c.bf16 %v23_v8, %v22_v7 }
   0x9   :  { %111 = vmatmul.mubr.msk.bf16.vlgmr.msra.gmra.mrb[0].mxu0 %vm48_vm1, %v24_v9 }
  0xdc   :  { %v86_v11 = vpop.f32.mrb[0].mxu0 }
  0xdd   :  { %v87_v12 = vadd.f32 %v99_v10, %v86_v11  ;;  %v112_v13 = vpop.f32.mrb[1].mxu0 }
  0xde   :  { %v89_v14 = vpop.f32.mrb[2].mxu0 }
  0xdf   :  { %93 = vst [vmem:[%s176_s4] sm:$0xff] %v87_v12  ;;  %v90_v15 = vadd.f32 %v99_v10, %v89_v14  ;;  %v113_v16 = vpop.f32.mrb[3].mxu0 }
  0xe1   :  { %94 = vst [vmem:[%s176_s4 + $0x8] sm:$0xff] %v90_v15 }

// kernel: lm_lstm_regularized_forward.5
= control target key start
LH: loop header
LB: loop body
LE: loop exit
PB: predicated region body
PF: predicated region fallthrough
CT: control target
= control target key end

     0   :  { %7 = vsyncpa [#allocation3], 0  ;;  %s1003_s0 = inlined_call_operand.hbm [shape: f32[16,32], index: 0, kind: input, shape index: {}]   ;;  %s1004_s1 = inlined_call_operand.hbm [shape: bf16[256,32], index: 1, kind: input, shape index: {}]   ;;  %s1005_s2 = inlined_call_operand.hbm [shape: f32[16,256], index: 2, kind: output, shape index: {}]  }
   0x1   :  { %8 = vsyncpa [#allocation6], 0 }
   0x2   :  { %10 = vsyncpa [#allocation6 + $0x1], 0 }
   0x3   :  { %11 = vsyncpa [#allocation4], 0 }
   0x4   :  { %13 = vsyncpa [#allocation4 + $0x1], 0  ;;  %s764_s9 = smov 0   ;;  %s766_s10 = smov 0  }
   0x5   :  { %s768_s11 = smov 0   ;;  %s770_s12 = smov 0  }
   0x6   :  { %s772_s13 = smov 0   ;;  %s774_s14 = smov 0  }
   0x7 LB: > { %s446_s15 = sadd.s32 4294967295, %s735_s14   ;;  %s447_s16 = sadd.s32 4294967294, %s735_s14   ;;  %s735_s14 = sphi %s774_s14, %s19_s14   ;;  %s731_s13 = sphi %s772_s13, %s1029_s13   ;;  %s727_s12 = sphi %s770_s12, %s1028_s12   ;;  %s723_s11 = sphi %s768_s11, %s1027_s11   ;;  %s719_s10 = sphi %s766_s10, %s1026_s10   ;;  %s715_s9 = sphi %s764_s9, %s1025_s9  }
   0x8   : > { %p77_p0 = scmp.ne.s32.totalorder %s719_s10, %s715_s9  ;;  %p798_p1 = scmp.eq.s32.totalorder %s446_s15, 0 }
   0x9   : > { %p802_p2 = scmp.eq.s32.totalorder %s446_s15, 1  ;;  %p109_p3 = scmp.eq.s32.totalorder %s447_s16, 1 }
   0xa   : > { %s1010_s17 = scalar_select %p798_p1, 1, 0 }
   0xb   : > { %s1011_s18 = scalar_select %p802_p2, 1, 0 }
   0xc   : > { %p808_p4 = por %p798_p1, %p77_p0  ;;  %p448_p5 = scmp.ge.s32.totalorder %s735_s14, 1 }
   0xd   : > { %p813_p6 = por %p109_p3, %p77_p0  ;;  %p116_p7 = scmp.lt.s32.totalorder %s735_s14, 3 }
   0xe   : > { %s1012_s19 = scalar_select %p808_p4, 1, 0 }
   0xf   : > { %s1013_s20 = scalar_select %p813_p6, 1, 0 }
  0x10   : > { %p818_p8 = pnand %p448_p5, %p116_p7  ;;  %s737_s22 = smov [#allocation2]  }
  0x11   : > { %s131_s23 = sshll.u32 %s737_s22, 4  ;;  %s31_s25 = sadd.s32 1, %s731_s13  ;;  %s132_s23 = int_to_ptr.vmem [resolvable:$true] %s131_s23 }
  0x12   : > { %s1014_s21 = scalar_select %p818_p8, 1, 0 }
  0x13   : > { %p509_p9 = pneg %p818_p8  ;;  %s591_s28 = scalar_lea.hbm %s1003_s0, 256 }
  0x14   : > { %p592_p12 = scmp.ne.s32.totalorder %s1003_s0, %s591_s28  ;;  %p598_p5 = scmp.lt.u32.totalorder %s591_s28, %s1003_s0 }
  0x15   : > { %p827_p11 = pnand %p509_p9, %p798_p1 }
  0x17   : > { %p593_p13 = pneg %p827_p11 }
  0x19   : > { %p594_p0 = pnand %p593_p13, %p592_p12 }
  0x1b   : > { %p595_p3 = pneg %p594_p0 }
  0x1d   : > { %p600_p7 = pnand %p598_p5, %p595_p3 }
  0x1f   : > { %603 = shalt.err (!%p600_p7)
}
  0x20   : > { %s604_s5 = scalar_lea.vmem %s132_s23, 256  ;;  %p612_p4 = scmp.lt.s32.totalorder %s132_s23, %s132_s23 }
  0x21   : > { %p605_p9 = scmp.ne.s32.totalorder %s132_s23, %s604_s5  ;;  %p613_p1 = scmp.lt.s32.totalorder %s604_s5, %s604_s5 }
  0x23   : > { %p607_p10 = pnand %p605_p9, %p593_p13  ;;  %p614_p8 = por %p613_p1, %p612_p4 }
  0x25   : > { %p608_p6 = pneg %p607_p10 }
  0x27   : > { %p615_p2 = pnand %p614_p8, %p608_p6 }
  0x29   : > { %618 = shalt.err (!%p615_p2)
}
  0x2a   : > { %s738_s6 = smov 128   ;;  %s739_s7 = smov 8  }
  0x2b   : > { %512 = dma.hbm_to_vmem [thread:$0]  (!%p827_p11), %s1003_s0, 256, %s132_s23, [#allocation3], %s738_s6, %s738_s6, %s739_s7  }
  0x2c   : > { %p33_p1 = scmp.ge.s32.totalorder %s31_s25, 2  ;;  %s64_s16 = sadd.s32 1, %s723_s11 }
  0x2d   : > { %p71_p2 = scmp.ne.s32.totalorder %s723_s11, %s719_s10  ;;  %p72_p4 = scmp.eq.s32.totalorder %s735_s14, 0 }
  0x2e   : > { %s1031_s25 = smov (%p33_p1, %s31_s25), 0  ;;  %p1017_p8 = scmp.ne.s32.totalorder %s1011_s18, 0 }
  0x2f   : > { %p854_p6 = por %p72_p4, %p71_p2  ;;  %s61_s24 = ssub.s32 %s731_s13, %s1031_s25 }
  0x30   : > { %p860_p10 = por %p1017_p8, %p71_p2  ;;  %p522_p12 = scmp.lt.s32.totalorder %s735_s14, 2 }
  0x31   : > { %p62_p11 = scmp.eq.s32.totalorder %s61_s24, 0  ;;  %s145_s23 = sand.u32 1, %s723_s11  }
  0x32   : > { %s451_s27 = sshll.u32 %s145_s23, 6  ;;  %s471_s29 = sshll.u32 %s731_s13, 10 }
  0x33   : > { %s869_s28 = scalar_select %p62_p11, %s723_s11, %s64_s16  }
  0x34   : > { %s875_s4 = scalar_lea.hbm %s1004_s1, %s471_s29  ;;  %s149_s18 = scalar_lea.vmem [#allocation5], %s451_s27 }
  0x35   : > { %s156_s5 = sshll.u32 %s149_s18, 4  ;;  %p881_p13 = pnand %p522_p12, %p854_p6  ;;  %s877_s5 = int_to_ptr.vmem [resolvable:$true] %s156_s5 }
  0x36   : > { %s885_s7 = scalar_lea.sflag [#allocation6], %s145_s23  ;;  %s619_s8 = scalar_lea.hbm %s875_s4, 1024 }
  0x37   : > { %p620_p0 = scmp.ne.s32.totalorder %s875_s4, %s619_s8  ;;  %p621_p3 = pneg %p881_p13 }
  0x38   : > { %s624_s22 = scalar_lea.hbm %s1004_s1, 2048  ;;  %p625_p9 = scmp.lt.u32.totalorder %s875_s4, %s1004_s1 }
  0x39   : > { %p622_p5 = pnand %p621_p3, %p620_p0  ;;  %p626_p1 = scmp.lt.u32.totalorder %s624_s22, %s619_s8 }
  0x3a   : > { %p628_p4 = scmp.lt.u32.totalorder %s619_s8, %s875_s4 }
  0x3b   : > { %p623_p7 = pneg %p622_p5  ;;  %p627_p2 = por %p626_p1, %p625_p9 }
  0x3d   : > { %p629_p6 = por %p628_p4, %p627_p2 }
  0x3f   : > { %p630_p8 = pnand %p629_p6, %p623_p7 }
  0x41   : > { %633 = shalt.err (!%p630_p8)
}
  0x42   : > { %s634_s23 = scalar_lea.vmem %s877_s5, 1024  ;;  %s740_s29 = smov [#allocation5]  }
  0x43   : > { %p635_p12 = scmp.ne.s32.totalorder %s877_s5, %s634_s23  ;;  %s639_s30 = sshll.u32 %s740_s29, 4  ;;  %s640_s30 = int_to_ptr.vmem [resolvable:$false] %s639_s30 }
  0x44   : > { %s641_s3 = scalar_lea.vmem %s640_s30, 2048  ;;  %p642_p5 = scmp.lt.s32.totalorder %s877_s5, %s640_s30 }
  0x45   : > { %p637_p11 = pnand %p635_p12, %p621_p3  ;;  %p643_p9 = scmp.lt.s32.totalorder %s641_s3, %s634_s23 }
  0x47   : > { %p638_p0 = pneg %p637_p11  ;;  %p644_p1 = por %p643_p9, %p642_p5 }
  0x49   : > { %p645_p2 = pnand %p644_p1, %p638_p0 }
  0x4b   : > { %648 = shalt.err (!%p645_p2)
}
  0x4c   : > { %s741_s18 = smov 64   ;;  %s742_s8 = smov 4  }
  0x4d   : > { %516 = dma.hbm_to_vmem [thread:$0]  (!%p881_p13), %s875_s4, 1024, %s877_s5, %s885_s7, %s741_s18, %s741_s18, %s742_s8  }
  0x4e   : > { %p1020_p3 = scmp.ne.s32.totalorder %s1014_s21, 0 }
  0x4f   : > { %p1021_p7 = scmp.ne.s32.totalorder (!%p1020_p3), %s1010_s17, 0 }
  0x50   : > { %168 = sbr.rel (%p1020_p3) target bundleno = 387 (0x183), region = 28 }
  0x57   : > { %702 = dma.done.wait (%p1021_p7), [#allocation3], 256  }
  0x58   : > { %704 = vsyncadd (%p1021_p7), [#allocation3], 4294967040  ;;  %s920_s15 = sand.u32 1, %s719_s10   ;;  %p1022_p13 = scmp.ne.s32.totalorder %s1012_s19, 0 }
  0x59   : > { %s456_s16 = sshll.u32 %s920_s15, 6  ;;  %s175_s22 = scalar_lea.sflag [#allocation6], %s920_s15 }
  0x5a   : > { %s924_s24 = scalar_lea.vmem [#allocation5], %s456_s16 }
  0x5b   : > { %706 = dma.done.wait (%p1022_p13), %s175_s22, 1024  }
  0x5c   : > { %708 = vsyncadd (%p1022_p13), %s175_s22, 4294966272  ;;  %v743_v0 = vmov 0.0   ;;  %vm744_vm0 = vmmov 0   ;;  %vm262_vm1 = vcmask 261120   ;;  %v583_v1 = vld [vmem:[%s924_s24] sm:$0xff]   ;;  %v584_v3 = vld [vmem:[%s924_s24 + $0x8] sm:$0xff]  }
  0x5d   : > { %481 = vmatprep.subr.bf16.mxu0 %v743_v0  ;;  %497 = vmatprep.mubr.msk.bf16.mxu0 %vm744_vm0, %v743_v0  ;;  %v267_v2 = vsel %vm262_vm1, %v583_v1, 0  ;;  %v270_v4 = vsel %vm262_vm1, %v584_v3, 0  ;;  %v585_v5 = vld [vmem:[%s924_s24 + $0x10] sm:$0xff]   ;;  %v586_v7 = vld [vmem:[%s924_s24 + $0x18] sm:$0xff]   ;;  %v587_v9 = vld [vmem:[%s924_s24 + $0x20] sm:$0xff]   ;;  %s457_s17 = sshll.u32 %s920_s15, 4 }
  0x5e   : > { %482 = vmatpush3.bf16.xpose.msra.mxu0 %v267_v2  ;;  %v273_v6 = vsel %vm262_vm1, %v585_v5, 0  ;;  %v276_v8 = vsel %vm262_vm1, %v586_v7, 0  ;;  %v279_v10 = vsel %vm262_vm1, %v587_v9, 0  ;;  %v588_v11 = vld [vmem:[%s924_s24 + $0x28] sm:$0xff]   ;;  %v589_v13 = vld [vmem:[%s924_s24 + $0x30] sm:$0xff]   ;;  %v590_v15 = vld [vmem:[%s924_s24 + $0x38] sm:$0xff]  }
  0x5f   : > { %483 = vmatprep.subr.bf16.mxu0 %v743_v0  ;;  %v282_v12 = vsel %vm262_vm1, %v588_v11, 0  ;;  %v285_v14 = vsel %vm262_vm1, %v589_v13, 0  ;;  %v288_v16 = vsel %vm262_vm1, %v590_v15, 0  ;;  %v203_v17 = vld [vmem:[#allocation2] sm:$0xff]  ;;  %v204_v18 = vld [vmem:[#allocation2 + $0x8] sm:$0xff]  ;;  %s198_s19 = scalar_lea.vmem [#allocation7], %s457_s17 }
  0x60   : > { %v205_v19 = vpack.c.bf16 %v204_v18, %v203_v17  ;;  %s349_s21 = sshll.u32 %s198_s19, 4  ;;  %s468_s4 = sshll.u32 %s727_s12, 7  ;;  %s949_s21 = int_to_ptr.vmem [resolvable:$true] %s349_s21 }
  0x61   : > { %s954_s7 = scalar_lea.hbm %s1005_s2, %s468_s4  ;;  %s334_s27 = scalar_lea.sflag [#allocation4], %s920_s15 }
  0x62   : > { %s649_s23 = scalar_lea.vmem %s949_s21, 256  ;;  %s745_s12 = smov [#allocation7]  }
  0x63   : > { %p650_p4 = scmp.ne.s32.totalorder %s949_s21, %s649_s23  ;;  %s653_s29 = sshll.u32 %s745_s12, 4  ;;  %s654_s29 = int_to_ptr.vmem [resolvable:$false] %s653_s29 }
  0x64   : > { %s655_s30 = scalar_lea.vmem %s654_s29, 512  ;;  %p656_p12 = scmp.lt.s32.totalorder %s949_s21, %s654_s29 }
  0x65   : > { %p651_p6 = pnand %p650_p4, %p860_p10  ;;  %p657_p11 = scmp.lt.s32.totalorder %s655_s30, %s649_s23 }
  0x66   : > { %484 = vmatpush3.bf16.xpose.msra.mxu0 %v270_v4 }
  0x67   : > { %485 = vmatprep.subr.bf16.mxu0 %v743_v0  ;;  %p652_p8 = pneg %p651_p6  ;;  %p658_p0 = por %p657_p11, %p656_p12 }
  0x69   : > { %p659_p5 = pnand %p658_p0, %p652_p8 }
  0x6e   : > { %486 = vmatpush3.bf16.xpose.msra.mxu0 %v273_v6 }
  0x6f   : > { %487 = vmatprep.subr.bf16.mxu0 %v743_v0 }
  0x76   : > { %488 = vmatpush3.bf16.xpose.msra.mxu0 %v276_v8 }
  0x77   : > { %489 = vmatprep.subr.bf16.mxu0 %v743_v0 }
  0x7e   : > { %490 = vmatpush3.bf16.xpose.msra.mxu0 %v279_v10 }
  0x7f   : > { %491 = vmatprep.subr.bf16.mxu0 %v743_v0 }
  0x86   : > { %492 = vmatpush3.bf16.xpose.msra.mxu0 %v282_v12 }
  0x87   : > { %493 = vmatprep.subr.bf16.mxu0 %v743_v0 }
  0x8e   : > { %494 = vmatpush3.bf16.xpose.msra.mxu0 %v285_v14 }
  0x8f   : > { %495 = vmatprep.subr.bf16.mxu0 %v743_v0 }
  0x96   : > { %496 = vmatpush3.bf16.xpose.msra.mxu0 %v288_v16 }
  0x9d   : > { %498 = vmatmul.mubr.msk.bf16.vlgmr.msra.gmra.mrb[0].mxu0 %vm262_vm1, %v205_v19 }
 0x170   : > { %v324_v20 = vpop.f32.mrb[0].mxu0 }
 0x171   : > { %331 = vst [vmem:[%s198_s19] sm:$0xff] %v324_v20  ;;  %v499_v21 = vpop.f32.mrb[1].mxu0 }
 0x172   : > { %v327_v22 = vpop.f32.mrb[2].mxu0 }
 0x173   : > { %332 = vst [vmem:[%s198_s19 + $0x8] sm:$0xff] %v327_v22  ;;  %v500_v23 = vpop.f32.mrb[3].mxu0 }
 0x174   : > { %662 = shalt.err (!%p659_p5)
}
 0x175   : > { %s663_s3 = scalar_lea.hbm %s954_s7, 256  ;;  %s667_s16 = scalar_lea.hbm %s1005_s2, 512 }
 0x176   : > { %p664_p9 = scmp.ne.s32.totalorder %s954_s7, %s663_s3  ;;  %p668_p3 = scmp.lt.u32.totalorder %s954_s7, %s1005_s2 }
 0x177   : > { %p669_p7 = scmp.lt.u32.totalorder %s667_s16, %s663_s3  ;;  %p671_p4 = scmp.lt.u32.totalorder %s663_s3, %s954_s7 }
 0x178   : > { %p665_p1 = pnand %p664_p9, %p860_p10 }
 0x179   : > { %p670_p13 = por %p669_p7, %p668_p3 }
 0x17a   : > { %p666_p2 = pneg %p665_p1 }
 0x17b   : > { %p672_p6 = por %p671_p4, %p670_p13 }
 0x17d   : > { %p673_p8 = pnand %p672_p6, %p666_p2 }
 0x17f   : > { %676 = shalt.err (!%p673_p8)
}
 0x180   : > { %s746_s17 = smov 128   ;;  %s747_s19 = smov 256  }
 0x181   : > { %s748_s4 = smov 8  }
 0x182   : > { %507 = dma.vmem_to_hbm [thread:$0]  (%p860_p10), %s949_s21, 256, %s954_s7, %s334_s27, %s746_s17, %s747_s19, %s748_s4  }
 0x183 PF: > { %s364_s5 = sand.u32 1, %s715_s9   ;;  %p1023_p12 = scmp.ne.s32.totalorder %s1013_s20, 0 }
 0x184   : > { %p1024_p11 = scmp.ge.s32.totalorder %s735_s14, 2  ;;  %s365_s6 = scalar_lea.sflag [#allocation4], %s364_s5 }
 0x186   : > { %p518_p0 = pnand %p1024_p11, %p1023_p12 }
 0x188   : > { %710 = dma.done.wait (!%p518_p0), %s365_s6, 256  }
 0x189   : > { %712 = vsyncadd (!%p518_p0), %s365_s6, 4294967040  ;;  %s19_s14 = sadd.s32 1, %s735_s14   ;;  %s1025_s9 = smov %s719_s10 }
 0x18a   : > { %p16_p5 = scmp.ge.s32.totalorder %s19_s14, 4   ;;  %s1026_s10 = smov %s723_s11 }
 0x18b   : > { %s1027_s11 = smov %s869_s28  ;;  %s1028_s12 = smov %s731_s13 }
 0x18c   : > { %s1029_s13 = smov %s1031_s25  ;;  %18 = sbr.rel (!%p16_p5) target bundleno = 7 (0x7), region = 79 }
 0x193   :  { %370 = vsyncpa [#allocation3], 1 }
 0x194   :  { %372 = vsyncpa [#allocation3 + $0x1], 1 }
 0x195   :  { %373 = vsyncpa [#allocation6], 1 }
 0x196   :  { %375 = vsyncpa [#allocation6 + $0x1], 1 }
 0x197   :  { %376 = vsyncpa [#allocation4], 1 }
 0x198   :  { %378 = vsyncpa [#allocation4 + $0x1], 1 }

// kernel: lm_lstm_regularized_forward.4
= control target key start
LH: loop header
LB: loop body
LE: loop exit
PB: predicated region body
PF: predicated region fallthrough
CT: control target
= control target key end

     0   :  { %8 = vsyncpa [#allocation5], 0  ;;  %s1031_s0 = inlined_call_operand.vmem [shape: f32[8,2,128], index: 0, kind: input, shape index: {}]   ;;  %s1032_s1 = inlined_call_operand.vmem [shape: bf16[32,128], index: 1, kind: input, shape index: {}]   ;;  %s1033_s2 = inlined_call_operand.vmem [shape: f32[2,32], index: 2, kind: input, shape index: {}]   ;;  %s1034_s3 = inlined_call_operand.hbm [shape: f32[8,2,32], index: 3, kind: output, shape index: {}]  }
   0x1   :  { %10 = vsyncpa [#allocation5 + $0x1], 0  ;;  %s860_s12 = smov 0   ;;  %s862_s13 = smov 0  }
   0x2   :  { %s864_s14 = smov 0   ;;  %s866_s15 = smov 0  }
   0x3 LB: > { %s881_s16 = sadd.s32 4294967295, %s830_s15   ;;  %s614_s17 = sadd.s32 4294967294, %s830_s15   ;;  %s830_s15 = sphi %s866_s15, %s1040_s15   ;;  %s826_s14 = sphi %s864_s14, %s1039_s14   ;;  %s822_s13 = sphi %s862_s13, %s1038_s13   ;;  %s818_s12 = sphi %s860_s12, %s1037_s12  }
   0x4   : > { %s885_s18 = sadd.s32 1, %s830_s15   ;;  %s91_s19 = sadd.s32 1, %s826_s14 }
   0x5   : > { %s88_s20 = ssub.s32 %s830_s15, %s885_s18  ;;  %p101_p0 = scmp.ne.s32.totalorder %s826_s14, %s822_s13 }
   0x6   : > { %p89_p1 = scmp.eq.s32.totalorder %s88_s20, 0  ;;  %p102_p2 = scmp.eq.s32.totalorder %s881_s16, 1 }
   0x7   : > { %p107_p3 = scmp.ne.s32.totalorder %s822_s13, %s818_s12  ;;  %p108_p4 = scmp.eq.s32.totalorder %s614_s17, 1 }
   0x8   : > { %s896_s21 = scalar_select %p89_p1, %s826_s14, %s91_s19  }
   0x9   : > { %p898_p5 = por %p102_p2, %p101_p0  ;;  %p902_p6 = por %p108_p4, %p107_p3 }
   0xa   : > { %p617_p7 = scmp.ge.s32.totalorder %s830_s15, 1  ;;  %p141_p8 = scmp.lt.s32.totalorder %s830_s15, 3 }
   0xc   : > { %p142_p9 = pnand %p617_p7, %p141_p8 }
   0xd   : > { %s162_s24 = sand.u32 (!%p142_p9), 1, %s822_s13   ;;  %s619_s25 = sshll.u32 (!%p142_p9), %s881_s16, 2 }
   0xe   : > { %145 = sbr.rel (%p142_p9) target bundleno = 2868 (0xb34), region = 32  ;;  %s618_s26 = sshll.u32 (!%p142_p9), %s162_s24, 3 }
   0xf   : > { %p166_p10 = scmp.lt.s32.totalorder (!%p142_p9), %s619_s25, 7  ;;  %s917_s4 = scalar_lea.vmem (!%p142_p9), [#allocation4], %s618_s26 }
  0x10   : > { %p621_p11 = scmp.ne.s32.totalorder (!%p142_p9), %s881_s16, 0 }
  0x15   : > { %s1042_s25 = smov (!%p166_p10, %s619_s25), 7  ;;  %176 = sbr.rel (%p621_p11) target bundleno = 28 (0x1c), region = 36 }
  0x16   : > { %s620_s27 = sshll.u32 %s1042_s25, 1  ;;  %vm177_vm0 = vcmask (!%p621_p11), 254976   ;;  %v832_v0 = vmov (!%p621_p11), 0.0  }
  0x17   : > { %s915_s30 = scalar_lea.vmem %s1031_s0, %s620_s27  ;;  %178 = vst.msk [vmem:[#allocation2] sm:$0x3] (!%p621_p11), %vm177_vm0, %v832_v0  ;;  %179 = vst.msk [vmem:[#allocation3] sm:$0x3] (!%p621_p11), %vm177_vm0, %v832_v0 }
  0x1c PF: > { %v734_v1 = vld [vmem:[%s1032_s1] sm:$0xff]   ;;  %v833_v2 = vmov 0.0   ;;  %v735_v3 = vld [vmem:[%s1032_s1 + $0x8] sm:$0xff]   ;;  %vm834_vm1 = vmmov 0   ;;  %vm201_vm2 = vcmask 261120   ;;  %s835_s9 = smov 64  }
  0x1d   : > { %656 = vmatprep.subr.bf16.mxu0 %v833_v2  ;;  %664 = vmatprep.subr.bf16.mxu1 %v833_v2  ;;  %v187_v6 = vld [vmem:[%s915_s30] sm:$0x3]  ;;  %s836_s10 = smov 32   ;;  %v626_v29 = vld [vmem:[%s915_s30 + $0x2] sm:$0x3]  ;;  %s837_s19 = smov 96  }
  0x1e   : > { %657 = vmatpush3.bf16.msra.mxu0 %v734_v1  ;;  %660 = vmatprep.mubr.msk.bf16.mxu0 %vm834_vm1, %v833_v2  ;;  %v185_v4 = vld [vmem:[#allocation2] sm:$0x3]  ;;  %v186_v13 = vld [vmem:[#allocation3] sm:$0x3]  ;;  %v630_v50 = vld [vmem:[%s915_s30 + $0x4] sm:$0x3] }
  0x1f   : > { %658 = vmatprep.subr.bf16.mxu0 %v833_v2  ;;  %665 = vmatpush3.bf16.msra.mxu1 %v734_v1  ;;  %v188_v5 = vpack.c.bf16 %v185_v4, %v185_v4  ;;  %vm283_vm3 = vcmask 254976   ;;  %s643_s20 = sshll.u32 %s881_s16, 7  ;;  %s552_s25 = sshll.u32 %s917_s4, 4  ;;  %s981_s25 = int_to_ptr.vmem [resolvable:$true] %s552_s25 }
  0x20   : > { %666 = vmatprep.subr.bf16.mxu1 %v833_v2  ;;  %668 = vmatprep.mubr.msk.bf16.mxu1 %vm834_vm1, %v833_v2  ;;  %s978_s28 = scalar_lea.hbm %s1034_s3, %s643_s20  ;;  %s987_s29 = scalar_lea.sflag [#allocation5], %s162_s24 }
  0x21   : > { %s768_s16 = scalar_lea.vmem %s981_s25, 128 }
  0x22   : > { %659 = vmatpush3.bf16.msra.mxu0 %v735_v3  ;;  %p769_p12 = scmp.ne.s32.totalorder %s981_s25, %s768_s16 }
  0x23   : > { %667 = vmatpush3.bf16.msra.mxu1 %v735_v3  ;;  %672 = vmatprep.subr.bf16.mxu0 %v833_v2 }
  0x24   : > { %680 = vmatprep.subr.bf16.mxu1 %v833_v2  ;;  %p770_p13 = pnand %p769_p12, %p898_p5 }
  0x25   : > { %661 = vmatmul.mubr.msk.bf16.vlgmr.msra.gmra.mrb[0].mxu0 %vm201_vm2, %v188_v5 }
  0x26   : > { %673 = vmatpush3.bf16.msra.mxu0 %v734_v1  ;;  %676 = vmatprep.mubr.msk.bf16.mxu0 %vm834_vm1, %v833_v2  ;;  %p771_p0 = pneg %p770_p13 }
  0x27   : > { %674 = vmatprep.subr.bf16.mxu0 %v833_v2 }
  0x2a   : > { %675 = vmatpush3.bf16.msra.mxu0 %v735_v3 }
  0xf8   : > { %v239_v7 = vpop.f32.mrb[0].mxu0 }
  0xf9   : > { %v245_v8 = vadd.f32 %v239_v7, %v187_v6  ;;  %v662_v9 = vpop.f32.mrb[1].mxu0  ;;  %v634_v7 = vld [vmem:[%s915_s30 + $0x6] sm:$0x3]  ;;  %s838_s30 = smov [#allocation4]  }
  0xfa   : > { %v242_v10 = vpop.f32.mrb[2].mxu0  ;;  %s772_s5 = sshll.u32 %s838_s30, 4  ;;  %s773_s5 = int_to_ptr.vmem [resolvable:$false] %s772_s5 }
  0xfb   : > { %736 = vtanh.f32 %v245_v8  ;;  %v663_v11 = vpop.f32.mrb[3].mxu0  ;;  %v625_v14 = vmul.f32 -1.442695, %v245_v8  ;;  %s774_s6 = scalar_lea.vmem %s773_s5, 256  ;;  %p775_p1 = scmp.lt.s32.totalorder %s981_s25, %s773_s5 }
  0xfc   : > { %p776_p2 = scmp.lt.s32.totalorder %s774_s6, %s768_s16 }
  0xfd   : > { %738 = vpow2.f32 %v625_v14 }
  0xfe   : > { %p777_p3 = por %p776_p2, %p775_p1 }
 0x100   : > { %p778_p4 = pnand %p777_p3, %p771_p0 }
 0x105   : > { %v737_v12 = vpop.eup %736 }
 0x106   : > { %259 = vrot.lane.b32.xlu0 %v737_v12, %s835_s9 }
 0x107   : > { %v739_v15 = vpop.eup %738 }
 0x108   : > { %v249_v16 = vadd.f32 1.0, %v739_v15 }
 0x10a   : > { %254 = vrot.lane.b32.xlu0 %v186_v13, %s836_s10  ;;  %740 = vrcp.f32 %v249_v16 }
 0x114   : > { %v741_v17 = vpop.eup %740 }
 0x178   : > { %v260_v18 = vpop.permute.xlu0 %259 }
 0x179   : > { %v262_v19 = vmul.f32 %v741_v17, %v260_v18 }
 0x17b   : > { %264 = vrot.lane.b32.xlu1 %v262_v19, %s836_s10 }
 0x17c   : > { %v255_v20 = vpop.permute.xlu0 %254 }
 0x17d   : > { %v257_v21 = vmul.f32 %v741_v17, %v255_v20  ;;  %v184_v20 = vld [vmem:[%s1033_s2] sm:$0x3] }
 0x1ed   : > { %v265_v22 = vpop.permute.xlu1 %264 }
 0x1ee   : > { %v267_v23 = vadd.f32 %v265_v22, %v257_v21 }
 0x1f0   : > { %742 = vtanh.f32 %v267_v23 }
 0x1fa   : > { %v743_v24 = vpop.eup %742 }
 0x1fb   : > { %270 = vrot.lane.b32.xlu1 %v743_v24, %s835_s9 }
 0x26d   : > { %v271_v25 = vpop.permute.xlu1 %270 }
 0x26e   : > { %v935_v26 = vmul.f32 %v741_v17, %v271_v25 }
 0x270   : > { %v287_v27 = vpack.c.bf16 %v935_v26, %v935_v26 }
 0x272   : > { %289 = vrot.lane.b32.xlu0 %v287_v27, %s836_s10 }
 0x2e4   : > { %v290_v28 = vpop.permute.xlu0 %289 }
 0x2e5   : > { %669 = vmatmul.mubr.msk.bf16.vlgmr.msra.gmra.mrb[0].mxu1 %vm201_vm2, %v290_v28 }
 0x2e6   : > { %681 = vmatpush3.bf16.msra.mxu1 %v734_v1  ;;  %684 = vmatprep.mubr.msk.bf16.mxu1 %vm834_vm1, %v833_v2 }
 0x2e7   : > { %682 = vmatprep.subr.bf16.mxu1 %v833_v2 }
 0x2ea   : > { %683 = vmatpush3.bf16.msra.mxu1 %v735_v3 }
 0x3b8   : > { %v328_v30 = vpop.f32.mrb[0].mxu1 }
 0x3b9   : > { %v334_v31 = vadd.f32 %v626_v29, %v328_v30  ;;  %v670_v32 = vpop.f32.mrb[1].mxu1 }
 0x3ba   : > { %v331_v33 = vpop.f32.mrb[2].mxu1 }
 0x3bb   : > { %744 = vtanh.f32 %v334_v31  ;;  %v671_v34 = vpop.f32.mrb[3].mxu1  ;;  %v628_v36 = vmul.f32 -1.442695, %v334_v31 }
 0x3bd   : > { %746 = vpow2.f32 %v628_v36 }
 0x3c5   : > { %v745_v35 = vpop.eup %744 }
 0x3c6   : > { %344 = vrot.lane.b32.xlu1 %v745_v35, %s835_s9 }
 0x3c7   : > { %v747_v37 = vpop.eup %746 }
 0x3c8   : > { %v338_v38 = vadd.f32 1.0, %v747_v37 }
 0x3ca   : > { %748 = vrcp.f32 %v338_v38 }
 0x3d4   : > { %v749_v39 = vpop.eup %748 }
 0x3d5   : > { %v342_v42 = vmul.f32 %v749_v39, %v267_v23 }
 0x438   : > { %v345_v40 = vpop.permute.xlu1 %344 }
 0x439   : > { %v347_v41 = vmul.f32 %v749_v39, %v345_v40 }
 0x43b   : > { %349 = vrot.lane.b32.xlu0 %v347_v41, %s836_s10 }
 0x4ad   : > { %v350_v43 = vpop.permute.xlu0 %349 }
 0x4ae   : > { %v352_v44 = vadd.f32 %v350_v43, %v342_v42 }
 0x4b0   : > { %750 = vtanh.f32 %v352_v44 }
 0x4ba   : > { %v751_v45 = vpop.eup %750 }
 0x4bb   : > { %355 = vrot.lane.b32.xlu1 %v751_v45, %s835_s9 }
 0x52d   : > { %v356_v46 = vpop.permute.xlu1 %355 }
 0x52e   : > { %v358_v47 = vmul.f32 %v749_v39, %v356_v46 }
 0x530   : > { %v368_v48 = vpack.c.bf16 %v358_v47, %v358_v47 }
 0x532   : > { %370 = vrot.lane.b32.xlu0 %v368_v48, %s836_s10 }
 0x5a4   : > { %v371_v49 = vpop.permute.xlu0 %370 }
 0x5a5   : > { %677 = vmatmul.mubr.msk.bf16.vlgmr.msra.gmra.mrb[4].mxu0 %vm201_vm2, %v371_v49 }
 0x678   : > { %v409_v51 = vpop.f32.mrb[4].mxu0 }
 0x679   : > { %v415_v52 = vadd.f32 %v630_v50, %v409_v51  ;;  %v678_v53 = vpop.f32.mrb[5].mxu0 }
 0x67a   : > { %v412_v54 = vpop.f32.mrb[6].mxu0 }
 0x67b   : > { %752 = vtanh.f32 %v415_v52  ;;  %v679_v55 = vpop.f32.mrb[7].mxu0  ;;  %v632_v57 = vmul.f32 -1.442695, %v415_v52 }
 0x67d   : > { %754 = vpow2.f32 %v632_v57 }
 0x685   : > { %v753_v56 = vpop.eup %752 }
 0x686   : > { %425 = vrot.lane.b32.xlu1 %v753_v56, %s835_s9 }
 0x687   : > { %v755_v58 = vpop.eup %754 }
 0x688   : > { %v419_v59 = vadd.f32 1.0, %v755_v58 }
 0x68a   : > { %756 = vrcp.f32 %v419_v59 }
 0x694   : > { %v757_v60 = vpop.eup %756 }
 0x695   : > { %v423_v63 = vmul.f32 %v757_v60, %v352_v44 }
 0x6f8   : > { %v426_v61 = vpop.permute.xlu1 %425 }
 0x6f9   : > { %v428_v62 = vmul.f32 %v757_v60, %v426_v61 }
 0x6fb   : > { %430 = vrot.lane.b32.xlu0 %v428_v62, %s836_s10 }
 0x76d   : > { %v431_v0 = vpop.permute.xlu0 %430 }
 0x76e   : > { %v433_v1 = vadd.f32 %v431_v0, %v423_v63 }
 0x770   : > { %758 = vtanh.f32 %v433_v1 }
 0x77a   : > { %v759_v2 = vpop.eup %758 }
 0x77b   : > { %436 = vrot.lane.b32.xlu1 %v759_v2, %s835_s9 }
 0x7ed   : > { %v437_v3 = vpop.permute.xlu1 %436 }
 0x7ee   : > { %v439_v4 = vmul.f32 %v757_v60, %v437_v3 }
 0x7f0   : > { %v449_v5 = vpack.c.bf16 %v439_v4, %v439_v4 }
 0x7f2   : > { %451 = vrot.lane.b32.xlu0 %v449_v5, %s836_s10 }
 0x864   : > { %v452_v6 = vpop.permute.xlu0 %451 }
 0x865   : > { %685 = vmatmul.mubr.msk.bf16.vlgmr.msra.gmra.mrb[4].mxu1 %vm201_vm2, %v452_v6 }
 0x938   : > { %v490_v8 = vpop.f32.mrb[4].mxu1 }
 0x939   : > { %v496_v9 = vadd.f32 %v634_v7, %v490_v8  ;;  %v686_v10 = vpop.f32.mrb[5].mxu1 }
 0x93a   : > { %v493_v11 = vpop.f32.mrb[6].mxu1 }
 0x93b   : > { %760 = vtanh.f32 %v496_v9  ;;  %v687_v12 = vpop.f32.mrb[7].mxu1  ;;  %v636_v14 = vmul.f32 -1.442695, %v496_v9 }
 0x93d   : > { %762 = vpow2.f32 %v636_v14 }
 0x945   : > { %v761_v13 = vpop.eup %760 }
 0x946   : > { %506 = vrot.lane.b32.xlu1 %v761_v13, %s835_s9 }
 0x947   : > { %v763_v15 = vpop.eup %762 }
 0x948   : > { %v500_v16 = vadd.f32 1.0, %v763_v15 }
 0x94a   : > { %764 = vrcp.f32 %v500_v16 }
 0x954   : > { %v765_v17 = vpop.eup %764 }
 0x955   : > { %v504_v21 = vmul.f32 %v765_v17, %v433_v1 }
 0x9b8   : > { %v507_v18 = vpop.permute.xlu1 %506 }
 0x9b9   : > { %v509_v19 = vmul.f32 %v765_v17, %v507_v18 }
 0x9bb   : > { %511 = vrot.lane.b32.xlu0 %v509_v19, %s836_s10 }
 0x9bf   : > { %275 = vrot.lane.b32.xlu0 %v184_v20, %s837_s19 }
 0xa2d   : > { %v512_v22 = vpop.permute.xlu0 %511 }
 0xa2e   : > { %v514_v23 = vadd.f32 %v512_v22, %v504_v21 }
 0xa30   : > { %766 = vtanh.f32 %v514_v23 }
 0xa31   : > { %v276_v24 = vpop.permute.xlu0 %275 }
 0xa32   : > { %v359_v25 = vmul.f32 %v358_v47, %v276_v24  ;;  %v278_v28 = vmul.f32 %v276_v24, %v935_v26  ;;  %v440_v29 = vmul.f32 %v439_v4, %v276_v24 }
 0xa34   : > { %361 = vrot.lane.b32.xlu0 %v359_v25, %s836_s10 }
 0xa3a   : > { %v767_v27 = vpop.eup %766 }
 0xa3b   : > { %517 = vrot.lane.b32.xlu1 %v767_v27, %s835_s9 }
 0xa3f   : > { %280 = vrot.lane.b32.xlu1 %v278_v28, %s836_s10 }
 0xa43   : > { %442 = vrot.lane.b32.xlu1 %v440_v29, %s836_s10 }
 0xaa6   : > { %v362_v30 = vpop.permute.xlu0 %361 }
 0xaa7   : > { %629 = vst.msk [vmem:[%s917_s4 + $0x2] sm:$0x3] %vm283_vm3, %v362_v30 }
 0xaad   : > { %v518_v31 = vpop.permute.xlu1 %517 }
 0xaae   : > { %v520_v32 = vmul.f32 %v765_v17, %v518_v31 }
 0xab0   : > { %v521_v33 = vmul.f32 %v520_v32, %v276_v24  ;;  %529 = vrot.lane.b32.xlu1 %v520_v32, %s836_s10 }
 0xab1   : > { %v281_v34 = vpop.permute.xlu1 %280 }
 0xab2   : > { %284 = vst.msk [vmem:[%s917_s4] sm:$0x3] %vm283_vm3, %v281_v34  ;;  %523 = vrot.lane.b32.xlu0 %v521_v33, %s836_s10 }
 0xab5   : > { %v443_v26 = vpop.permute.xlu1 %442 }
 0xab6   : > { %633 = vst.msk [vmem:[%s917_s4 + $0x4] sm:$0x3] %vm283_vm3, %v443_v26  ;;  %534 = vrot.lane.b32.xlu0 %v514_v23, %s837_s19 }
 0xb22   : > { %v530_v35 = vpop.permute.xlu1 %529 }
 0xb23   : > { %532 = vst.msk [vmem:[#allocation2] sm:$0x3] %vm283_vm3, %v530_v35 }
 0xb24   : > { %v524_v36 = vpop.permute.xlu0 %523 }
 0xb25   : > { %637 = vst.msk [vmem:[%s917_s4 + $0x6] sm:$0x3] %vm283_vm3, %v524_v36 }
 0xb26   : > { %781 = shalt.err (!%p778_p4)
}
 0xb27   : > { %s782_s24 = scalar_lea.hbm %s978_s28, 128  ;;  %s786_s8 = scalar_lea.hbm %s1034_s3, 256 }
 0xb28   : > { %p783_p7 = scmp.ne.s32.totalorder %s978_s28, %s782_s24  ;;  %p787_p10 = scmp.lt.u32.totalorder %s978_s28, %s1034_s3 }
 0xb29   : > { %p788_p11 = scmp.lt.u32.totalorder %s786_s8, %s782_s24  ;;  %p790_p13 = scmp.lt.u32.totalorder %s782_s24, %s978_s28 }
 0xb2a   : > { %p784_p8 = pnand %p783_p7, %p898_p5 }
 0xb2b   : > { %p789_p12 = por %p788_p11, %p787_p10 }
 0xb2c   : > { %p785_p9 = pneg %p784_p8 }
 0xb2d   : > { %p791_p0 = por %p790_p13, %p789_p12 }
 0xb2f   : > { %p792_p1 = pnand %p791_p0, %p785_p9 }
 0xb31   : > { %795 = shalt.err (!%p792_p1)
}
 0xb32   : > { %s839_s17 = smov 2   ;;  %v535_v37 = vpop.permute.xlu0 %534 }
 0xb33   : > { %688 = dma.vmem_to_hbm [thread:$0]  (%p898_p5), %s981_s25, 128, %s978_s28, %s987_s29, %s836_s10, %s836_s10, %s839_s17   ;;  %537 = vst.msk [vmem:[#allocation3] sm:$0x3] %vm283_vm3, %v535_v37 }
 0xb34 PF: > { %p694_p2 = scmp.ge.s32.totalorder %s830_s15, 2  ;;  %s567_s19 = sand.u32 1, %s818_s12  }
 0xb35   : > { %s568_s20 = scalar_lea.sflag [#allocation5], %s567_s19 }
 0xb36   : > { %p691_p3 = pnand %p694_p2, %p902_p6 }
 0xb38   : > { %813 = dma.done.wait (!%p691_p3), %s568_s20, 128  }
 0xb39   : > { %815 = vsyncadd (!%p691_p3), %s568_s20, 4294967168  ;;  %p13_p5 = scmp.ge.s32.totalorder %s885_s18, 4   ;;  %s1037_s12 = smov %s822_s13 }
 0xb3a   : > { %s1038_s13 = smov %s826_s14  ;;  %s1039_s14 = smov %s896_s21 }
 0xb3b   : > { %s1040_s15 = smov %s885_s18  ;;  %15 = sbr.rel (!%p13_p5) target bundleno = 3 (0x3), region = 77 }
 0xb42   :  { %573 = vsyncpa [#allocation5], 1 }
 0xb43   :  { %575 = vsyncpa [#allocation5 + $0x1], 1 }

</bundles_post_ra>
